<compile_context>
chip_gen: v7x
topology: tpu7x:2x2x1
jax: 0.10.0
libtpu: 0.0.40
codegen_flags: <defaults>
</compile_context>

<pallas_src>
import functools

import jax
import jax.numpy as jnp
from jax.experimental import pallas as pl
from jax.experimental.pallas import tpu as pltpu


def _attention_kernel(x_ref, wq_ref, wk_ref, wv_ref, wproj_ref, bproj_ref,
                      out_ref, attn_ref, acc_ref, *, scale):
    h = pl.program_id(1)
    last_h = pl.num_programs(1) - 1

    x = x_ref[0]                 # (N, C)
    wq = wq_ref[0]               # (C, hd)
    wk = wk_ref[0]               # (C, hd)
    wv = wv_ref[0]               # (C, hd)
    wp = wproj_ref[0]            # (hd, C)

    # Per-head projections. Scale is folded into q: N*hd multiplies instead of N*N.
    q = jnp.dot(x, wq, preferred_element_type=jnp.float32) * scale       # (N, hd)
    k = jnp.dot(x, wk, preferred_element_type=jnp.float32)               # (N, hd)
    v = jnp.dot(x, wv, preferred_element_type=jnp.float32)               # (N, hd)

    # q @ k^T without materializing a transpose: contract both operands on the last dim.
    s = jax.lax.dot_general(q, k, dimension_numbers=(((1,), (1,)), ((), ())),
                            preferred_element_type=jnp.float32)           # (N, N)

    # Softmax (fp32 statistics).
    s = s - jnp.max(s, axis=-1, keepdims=True)
    p = jnp.exp(s)
    p = p * pl.reciprocal(jnp.sum(p, axis=-1, keepdims=True), approx=False)

    attn_ref[0, 0] = p.astype(attn_ref.dtype)

    o = jnp.dot(p, v, preferred_element_type=jnp.float32)                # (N, hd)

    # Accumulate this head's contribution to the output projection.
    @pl.when(h == 0)
    def _():
        acc_ref[...] = jnp.zeros_like(acc_ref)

    acc_ref[...] += jnp.dot(o, wp, preferred_element_type=jnp.float32)   # (N, C)

    @pl.when(h == last_h)
    def _():
        out_ref[0] = (acc_ref[...] + bproj_ref[...]).astype(out_ref.dtype)


def prepare_params(w_qkv, w_proj, b_proj, *, num_heads):
    """One-time parameter transform (hoisted out of the per-call forward path).

    w_qkv: (3C, C) torch Linear layout; w_proj: (C, C) torch layout; b_proj: (C,).
    """
    three_c, C = w_qkv.shape
    assert three_c == 3 * C and C % num_heads == 0
    hd = C // num_heads

    w_qkv_t = jnp.transpose(w_qkv)                                # (C, 3C), columns [q | k | v]
    wq_h = w_qkv_t[:, 0 * C:1 * C].reshape(C, num_heads, hd).transpose(1, 0, 2)   # (H, C, hd)
    wk_h = w_qkv_t[:, 1 * C:2 * C].reshape(C, num_heads, hd).transpose(1, 0, 2)
    wv_h = w_qkv_t[:, 2 * C:3 * C].reshape(C, num_heads, hd).transpose(1, 0, 2)

    wproj_h = jnp.transpose(w_proj).reshape(num_heads, hd, C)     # (H, hd, C)
    b2 = b_proj.reshape(1, C)
    return wq_h, wk_h, wv_h, wproj_h, b2


def attention_forward(x, params, *, num_heads, qk_scale=None):
    """x: (B, N, C); params: output of prepare_params()."""
    wq_h, wk_h, wv_h, wproj_h, b2 = params
    B, N, C = x.shape
    hd = C // num_heads
    scale = qk_scale if qk_scale is not None else hd ** (-0.5)

    kernel = functools.partial(_attention_kernel, scale=scale)

    # Rough per-step VMEM estimate (fp32) to decide whether to raise the scoped limit
    # (re-derived per problem size; relevant for v7x's 64 MiB / v6e's 32 MiB default).
    itemsize = 4
    per_step = itemsize * (N * C + 3 * C * hd + hd * C + C        # input blocks
                           + N * C + N * N)                       # output blocks
    vmem_needed = 2 * per_step + itemsize * N * C + (4 << 20)     # double-buffers + scratch + headroom
    cp_kwargs = dict(dimension_semantics=("parallel", "arbitrary"))
    if vmem_needed > (32 << 20):
        cp_kwargs["vmem_limit_bytes"] = int(min(vmem_needed, 64 << 20))

    out, attn = pl.pallas_call(
        kernel,
        out_shape=(
            jax.ShapeDtypeStruct((B, N, C), x.dtype),
            jax.ShapeDtypeStruct((B, num_heads, N, N), jnp.float32),
        ),
        grid_spec=pltpu.PrefetchScalarGridSpec(
            num_scalar_prefetch=0,
            grid=(B, num_heads),
            in_specs=[
                pl.BlockSpec((1, N, C), lambda b, h: (b, 0, 0)),       # x (resident across heads)
                pl.BlockSpec((1, C, hd), lambda b, h: (h, 0, 0)),      # wq (per head)
                pl.BlockSpec((1, C, hd), lambda b, h: (h, 0, 0)),      # wk (per head)
                pl.BlockSpec((1, C, hd), lambda b, h: (h, 0, 0)),      # wv (per head)
                pl.BlockSpec((1, hd, C), lambda b, h: (h, 0, 0)),      # wproj row-block (per head)
                pl.BlockSpec((1, C), lambda b, h: (0, 0)),             # proj bias
            ],
            out_specs=[
                pl.BlockSpec((1, N, C), lambda b, h: (b, 0, 0)),       # y (accumulated over heads)
                pl.BlockSpec((1, 1, N, N), lambda b, h: (b, h, 0, 0)), # attn (per head)
            ],
            scratch_shapes=[pltpu.VMEM((N, C), jnp.float32)],          # y accumulator
        ),
        compiler_params=pltpu.CompilerParams(**cp_kwargs),
    )(x, wq_h, wk_h, wv_h, wproj_h, b2)
    return out, attn


def attention_reference(x, w_qkv, w_proj, b_proj, *, num_heads):
    """Pure-JAX replica of the PyTorch forward for verification."""
    B, N, C = x.shape
    hd = C // num_heads
    scale = hd ** (-0.5)
    qkv = jnp.einsum('bnc,dc->bnd', x, w_qkv)                       # (B, N, 3C)
    qkv = qkv.reshape(B, N, 3, num_heads, hd).transpose(2, 0, 3, 1, 4)
    q, k, v = qkv[0], qkv[1], qkv[2]                                # (B, H, N, hd)
    attn = jnp.einsum('bhnd,bhmd->bhnm', q, k) * scale
    attn = jax.nn.softmax(attn, axis=-1)
    o = jnp.einsum('bhnm,bhmd->bhnd', attn, v)                      # (B, H, N, hd)
    o = o.transpose(0, 2, 1, 3).reshape(B, N, C)
    y = jnp.einsum('bnc,dc->bnd', o, w_proj) + b_proj
    return y, attn


if __name__ == "__main__":
    B, N, C = 2, 8, 32
    num_heads = 4

    key = jax.random.PRNGKey(0)
    k_x, k_qkv, k_proj, k_bias = jax.random.split(key, 4)

    x = jax.random.normal(k_x, (B, N, C), dtype=jnp.float32)
    # Deterministic parameter init (torch layout: Linear weight is (out, in)).
    w_qkv = jax.random.normal(k_qkv, (3 * C, C), dtype=jnp.float32) * (1.0 / C ** 0.5)
    w_proj = jax.random.normal(k_proj, (C, C), dtype=jnp.float32) * (1.0 / C ** 0.5)
    b_proj = jax.random.normal(k_bias, (C,), dtype=jnp.float32) * 0.01

    params = prepare_params(w_qkv, w_proj, b_proj, num_heads=num_heads)

    y, attn = attention_forward(x, params, num_heads=num_heads)
    y = jax.block_until_ready(y)
    attn = jax.block_until_ready(attn)

    y_ref, attn_ref = attention_reference(x, w_qkv, w_proj, b_proj, num_heads=num_heads)

    assert y.shape == (B, N, C) and attn.shape == (B, num_heads, N, N)
    assert jnp.allclose(y, y_ref, atol=1e-4, rtol=1e-4)
    assert jnp.allclose(attn, attn_ref, atol=1e-5, rtol=1e-5)

    print("KERNEL_OK")
</pallas_src>

<mosaic_0001>
module attributes {stable_mosaic.version = 11 : i64} {
  func.func @_attention_kernel(%arg0: i32, %arg1: i32, %arg2: memref<1x8x32xf32, #tpu.memory_space<vmem>>, %arg3: memref<1x32x8xf32, #tpu.memory_space<vmem>>, %arg4: memref<1x32x8xf32, #tpu.memory_space<vmem>>, %arg5: memref<1x32x8xf32, #tpu.memory_space<vmem>>, %arg6: memref<1x8x32xf32, #tpu.memory_space<vmem>>, %arg7: memref<1x32xf32, #tpu.memory_space<vmem>>, %arg8: memref<1x8x32xf32, #tpu.memory_space<vmem>>, %arg9: memref<1x1x8x8xf32, #tpu.memory_space<vmem>>, %arg10: memref<8x32xf32, #tpu.memory_space<vmem>>) attributes {dimension_semantics = [#tpu.dimension_semantics<parallel>, #tpu.dimension_semantics<arbitrary>], iteration_bounds = array<i64: 2, 4>, scalar_prefetch = 0 : i64, scratch_operands = 1 : i64, tpu.core_type = #tpu.core_type<tc>, window_params = [{transform_indices = @transform_0, window_bounds = array<i64: 1, 8, 32>}, {transform_indices = @transform_1, window_bounds = array<i64: 1, 32, 8>}, {transform_indices = @transform_2, window_bounds = array<i64: 1, 32, 8>}, {transform_indices = @transform_3, window_bounds = array<i64: 1, 32, 8>}, {transform_indices = @transform_4, window_bounds = array<i64: 1, 8, 32>}, {pipeline_mode = #tpu.pipeline_mode<synchronous>, transform_indices = @transform_5, window_bounds = array<i64: 1, 32>}, {transform_indices = @transform_6, window_bounds = array<i64: 1, 8, 32>}, {transform_indices = @transform_7, window_bounds = array<i64: 1, 1, 8, 8>}]} {
    %c0 = arith.constant 0 : index
    %c0_0 = arith.constant 0 : index
    %c0_1 = arith.constant 0 : index
    %0 = vector.load %arg2[%c0, %c0_0, %c0_1] : memref<1x8x32xf32, #tpu.memory_space<vmem>>, vector<1x8x32xf32>
    %1 = vector.shape_cast %0 : vector<1x8x32xf32> to vector<8x32xf32>
    %c0_2 = arith.constant 0 : index
    %c0_3 = arith.constant 0 : index
    %c0_4 = arith.constant 0 : index
    %2 = vector.load %arg3[%c0_2, %c0_3, %c0_4] : memref<1x32x8xf32, #tpu.memory_space<vmem>>, vector<1x32x8xf32>
    %3 = vector.shape_cast %2 : vector<1x32x8xf32> to vector<32x8xf32>
    %c0_5 = arith.constant 0 : index
    %c0_6 = arith.constant 0 : index
    %c0_7 = arith.constant 0 : index
    %4 = vector.load %arg4[%c0_5, %c0_6, %c0_7] : memref<1x32x8xf32, #tpu.memory_space<vmem>>, vector<1x32x8xf32>
    %5 = vector.shape_cast %4 : vector<1x32x8xf32> to vector<32x8xf32>
    %c0_8 = arith.constant 0 : index
    %c0_9 = arith.constant 0 : index
    %c0_10 = arith.constant 0 : index
    %6 = vector.load %arg5[%c0_8, %c0_9, %c0_10] : memref<1x32x8xf32, #tpu.memory_space<vmem>>, vector<1x32x8xf32>
    %7 = vector.shape_cast %6 : vector<1x32x8xf32> to vector<32x8xf32>
    %c0_11 = arith.constant 0 : index
    %c0_12 = arith.constant 0 : index
    %c0_13 = arith.constant 0 : index
    %8 = vector.load %arg6[%c0_11, %c0_12, %c0_13] : memref<1x8x32xf32, #tpu.memory_space<vmem>>, vector<1x8x32xf32>
    %9 = vector.shape_cast %8 : vector<1x8x32xf32> to vector<8x32xf32>
    %cst = arith.constant dense<0.000000e+00> : vector<8x8xf32>
    %10 = tpu.matmul %1, %3, %cst {dimension_numbers = #tpu.dot_dimension_numbers<[1], [0], [0], [1], [0, 0, 1, 1], [], []>} : vector<8x32xf32>, vector<32x8xf32>, vector<8x8xf32> -> vector<8x8xf32>
    %cst_14 = arith.constant 0.353553385 : f32
    %11 = vector.broadcast %cst_14 : f32 to vector<8x8xf32>
    %12 = arith.mulf %10, %11 : vector<8x8xf32>
    %cst_15 = arith.constant dense<0.000000e+00> : vector<8x8xf32>
    %13 = tpu.matmul %1, %5, %cst_15 {dimension_numbers = #tpu.dot_dimension_numbers<[1], [0], [0], [1], [0, 0, 1, 1], [], []>} : vector<8x32xf32>, vector<32x8xf32>, vector<8x8xf32> -> vector<8x8xf32>
    %cst_16 = arith.constant dense<0.000000e+00> : vector<8x8xf32>
    %14 = tpu.matmul %1, %7, %cst_16 {dimension_numbers = #tpu.dot_dimension_numbers<[1], [0], [0], [1], [0, 0, 1, 1], [], []>} : vector<8x32xf32>, vector<32x8xf32>, vector<8x8xf32> -> vector<8x8xf32>
    %cst_17 = arith.constant dense<0.000000e+00> : vector<8x8xf32>
    %15 = tpu.matmul %12, %13, %cst_17 {dimension_numbers = #tpu.dot_dimension_numbers<[1], [1], [0], [0], [0, 0, 1, 0], [], []>} : vector<8x8xf32>, vector<8x8xf32>, vector<8x8xf32> -> vector<8x8xf32>
    %cst_18 = arith.constant dense<0xFF800000> : vector<8xf32>
    %16 = vector.multi_reduction <maximumf>, %15, %cst_18 [1] : vector<8x8xf32> to vector<8xf32>
    %17 = vector.shape_cast %16 : vector<8xf32> to vector<8x1xf32>
    %18 = vector.broadcast %17 : vector<8x1xf32> to vector<8x8xf32>
    %19 = arith.subf %15, %18 : vector<8x8xf32>
    %20 = math.exp %19 : vector<8x8xf32>
    %cst_19 = arith.constant dense<0.000000e+00> : vector<8xf32>
    %21 = vector.multi_reduction <add>, %20, %cst_19 [1] : vector<8x8xf32> to vector<8xf32>
    %22 = vector.shape_cast %21 : vector<8xf32> to vector<8x1xf32>
    %23 = tpu.reciprocal %22 : vector<8x1xf32> -> vector<8x1xf32>
    %24 = vector.broadcast %23 : vector<8x1xf32> to vector<8x8xf32>
    %25 = arith.mulf %20, %24 : vector<8x8xf32>
    %c0_20 = arith.constant 0 : index
    %c0_21 = arith.constant 0 : index
    %c0_22 = arith.constant 0 : index
    %c0_23 = arith.constant 0 : index
    %26 = vector.load %arg9[%c0_20, %c0_21, %c0_22, %c0_23] : memref<1x1x8x8xf32, #tpu.memory_space<vmem>>, vector<1x1x8x8xf32>
    %27 = vector.shape_cast %26 : vector<1x1x8x8xf32> to vector<8x8xf32>
    %28 = vector.shape_cast %25 : vector<8x8xf32> to vector<1x1x8x8xf32>
    tpu.vector_store %arg9[%c0_20, %c0_21, %c0_22, %c0_23], %28 {strides = array<i32>} : memref<1x1x8x8xf32, #tpu.memory_space<vmem>>, vector<1x1x8x8xf32>,
    %cst_24 = arith.constant dense<0.000000e+00> : vector<8x8xf32>
    %29 = tpu.matmul %25, %14, %cst_24 {dimension_numbers = #tpu.dot_dimension_numbers<[1], [0], [0], [1], [0, 0, 1, 1], [], []>} : vector<8x8xf32>, vector<8x8xf32>, vector<8x8xf32> -> vector<8x8xf32>
    %c0_i32 = arith.constant 0 : i32
    %30 = arith.cmpi eq, %arg1, %c0_i32 : i32
    %31 = arith.extui %30 : i1 to i32
    %c0_i32_25 = arith.constant 0 : i32
    %32 = arith.cmpi ne, %31, %c0_i32_25 : i32
    scf.if %32 {
      %cst_32 = arith.constant 0.000000e+00 : f32
      %40 = vector.broadcast %cst_32 : f32 to vector<8x32xf32>
      %c0_33 = arith.constant 0 : index
      %c0_34 = arith.constant 0 : index
      %41 = vector.load %arg10[%c0_33, %c0_34] : memref<8x32xf32, #tpu.memory_space<vmem>>, vector<8x32xf32>
      tpu.vector_store %arg10[%c0_33, %c0_34], %40 {strides = array<i32>} : memref<8x32xf32, #tpu.memory_space<vmem>>, vector<8x32xf32>,
    } else {
    }
    %c0_26 = arith.constant 0 : index
    %c0_27 = arith.constant 0 : index
    %33 = vector.load %arg10[%c0_26, %c0_27] : memref<8x32xf32, #tpu.memory_space<vmem>>, vector<8x32xf32>
    %cst_28 = arith.constant dense<0.000000e+00> : vector<8x32xf32>
    %34 = tpu.matmul %29, %9, %cst_28 {dimension_numbers = #tpu.dot_dimension_numbers<[1], [0], [0], [1], [0, 0, 1, 1], [], []>} : vector<8x8xf32>, vector<8x32xf32>, vector<8x32xf32> -> vector<8x32xf32>
    %35 = arith.addf %33, %34 : vector<8x32xf32>
    %c0_29 = arith.constant 0 : index
    %c0_30 = arith.constant 0 : index
    %36 = vector.load %arg10[%c0_29, %c0_30] : memref<8x32xf32, #tpu.memory_space<vmem>>, vector<8x32xf32>
    tpu.vector_store %arg10[%c0_29, %c0_30], %35 {strides = array<i32>} : memref<8x32xf32, #tpu.memory_space<vmem>>, vector<8x32xf32>,
    %c3_i32 = arith.constant 3 : i32
    %37 = arith.cmpi eq, %arg1, %c3_i32 : i32
    %38 = arith.extui %37 : i1 to i32
    %c0_i32_31 = arith.constant 0 : i32
    %39 = arith.cmpi ne, %38, %c0_i32_31 : i32
    scf.if %39 {
      %c0_32 = arith.constant 0 : index
      %c0_33 = arith.constant 0 : index
      %40 = vector.load %arg10[%c0_32, %c0_33] : memref<8x32xf32, #tpu.memory_space<vmem>>, vector<8x32xf32>
      %c0_34 = arith.constant 0 : index
      %c0_35 = arith.constant 0 : index
      %41 = vector.load %arg7[%c0_34, %c0_35] : memref<1x32xf32, #tpu.memory_space<vmem>>, vector<1x32xf32>
      %42 = vector.broadcast %41 : vector<1x32xf32> to vector<8x32xf32>
      %43 = arith.addf %40, %42 : vector<8x32xf32>
      %c0_36 = arith.constant 0 : index
      %c0_37 = arith.constant 0 : index
      %c0_38 = arith.constant 0 : index
      %44 = vector.load %arg8[%c0_36, %c0_37, %c0_38] : memref<1x8x32xf32, #tpu.memory_space<vmem>>, vector<1x8x32xf32>
      %45 = vector.shape_cast %44 : vector<1x8x32xf32> to vector<8x32xf32>
      %46 = vector.shape_cast %43 : vector<8x32xf32> to vector<1x8x32xf32>
      tpu.vector_store %arg8[%c0_36, %c0_37, %c0_38], %46 {strides = array<i32>} : memref<1x8x32xf32, #tpu.memory_space<vmem>>, vector<1x8x32xf32>,
    } else {
    }
    return
  }
  func.func @transform_0(%arg0: i32, %arg1: i32) -> (i32, i32, i32) {
    %c0_i32 = arith.constant 0 : i32
    %c0_i32_0 = arith.constant 0 : i32
    %c0_i32_1 = arith.constant 0 : i32
    return %arg0, %c0_i32, %c0_i32_0 : i32, i32, i32
  }
  func.func @transform_1(%arg0: i32, %arg1: i32) -> (i32, i32, i32) {
    %c0_i32 = arith.constant 0 : i32
    %c0_i32_0 = arith.constant 0 : i32
    %c0_i32_1 = arith.constant 0 : i32
    return %arg1, %c0_i32, %c0_i32_0 : i32, i32, i32
  }
  func.func @transform_2(%arg0: i32, %arg1: i32) -> (i32, i32, i32) {
    %c0_i32 = arith.constant 0 : i32
    %c0_i32_0 = arith.constant 0 : i32
    %c0_i32_1 = arith.constant 0 : i32
    return %arg1, %c0_i32, %c0_i32_0 : i32, i32, i32
  }
  func.func @transform_3(%arg0: i32, %arg1: i32) -> (i32, i32, i32) {
    %c0_i32 = arith.constant 0 : i32
    %c0_i32_0 = arith.constant 0 : i32
    %c0_i32_1 = arith.constant 0 : i32
    return %arg1, %c0_i32, %c0_i32_0 : i32, i32, i32
  }
  func.func @transform_4(%arg0: i32, %arg1: i32) -> (i32, i32, i32) {
    %c0_i32 = arith.constant 0 : i32
    %c0_i32_0 = arith.constant 0 : i32
    %c0_i32_1 = arith.constant 0 : i32
    return %arg1, %c0_i32, %c0_i32_0 : i32, i32, i32
  }
  func.func @transform_5(%arg0: i32, %arg1: i32) -> (i32, i32) {
    %c0_i32 = arith.constant 0 : i32
    %c0_i32_0 = arith.constant 0 : i32
    %c0_i32_1 = arith.constant 0 : i32
    return %c0_i32, %c0_i32_0 : i32, i32
  }
  func.func @transform_6(%arg0: i32, %arg1: i32) -> (i32, i32, i32) {
    %c0_i32 = arith.constant 0 : i32
    %c0_i32_0 = arith.constant 0 : i32
    %c0_i32_1 = arith.constant 0 : i32
    return %arg0, %c0_i32, %c0_i32_0 : i32, i32, i32
  }
  func.func @transform_7(%arg0: i32, %arg1: i32) -> (i32, i32, i32, i32) {
    %c0_i32 = arith.constant 0 : i32
    %c0_i32_0 = arith.constant 0 : i32
    %c0_i32_1 = arith.constant 0 : i32
    return %arg0, %arg1, %c0_i32, %c0_i32_0 : i32, i32, i32, i32
  }
}

</mosaic_0001>

<bundles_post_ra>
// kernel: tpu_custom_call.1
= control target key start
LH: loop header
LB: loop body
LE: loop exit
PB: predicated region body
PF: predicated region fallthrough
CT: control target
= control target key end

     0   :  { %13 = vsyncpa [#allocation4], 0  ;;  %s1766_s0 = inlined_call_operand.vmem [shape: f32[2,8,32], index: 0, kind: input, shape index: {}]   ;;  %s1767_s1 = inlined_call_operand.vmem [shape: f32[4,32,8], index: 1, kind: input, shape index: {}]   ;;  %s1768_s2 = inlined_call_operand.vmem [shape: f32[4,32,8], index: 2, kind: input, shape index: {}]   ;;  %s1769_s3 = inlined_call_operand.vmem [shape: f32[4,32,8], index: 3, kind: input, shape index: {}]   ;;  %s1770_s4 = inlined_call_operand.vmem [shape: f32[4,8,32], index: 4, kind: input, shape index: {}]   ;;  %s1771_s5 = inlined_call_operand.vmem [shape: f32[1,32], index: 5, kind: input, shape index: {}]   ;;  %s1772_s6 = inlined_call_operand.hbm [shape: f32[2,8,32], index: 6, kind: output, shape index: {0}]   ;;  %s1773_s7 = inlined_call_operand.hbm [shape: f32[2,4,8,8], index: 7, kind: output, shape index: {1}]  }
   0x1   :  { %15 = vsyncpa [#allocation4 + $0x1], 0 }
   0x2   :  { %16 = vsyncpa [#allocation6], 0 }
   0x3   :  { %18 = vsyncpa [#allocation6 + $0x1], 0  ;;  %s1476_s24 = smov 0   ;;  %s1478_s25 = smov 0  }
   0x4   :  { %s1480_s26 = smov 0   ;;  %s1482_s27 = smov 0  }
   0x5   :  { %s1484_s28 = smov 0   ;;  %s1486_s29 = smov 0  }
   0x6   :  { %s1488_s30 = smov 0   ;;  %s1490_s8 = smov 0  }
   0x7   :  { %s1492_s9 = smov 0   ;;  %s1494_s10 = smov 0  }
   0x8   :  { %s1496_s11 = smov 0  }
   0x9 LB: > { %1784 = sst [smem:[#allocation9_spill]] %s1396_s26  ;;  %s1048_s12 = sadd.s32 4294967295, %s1428_s11   ;;  %s1428_s11 = sphi %s1496_s11, %s24_s11   ;;  %s1424_s10 = sphi %s1494_s10, %s1812_s10   ;;  %s1420_s9 = sphi %s1492_s9, %s1811_s9   ;;  %s1416_s8 = sphi %s1490_s8, %s1810_s8   ;;  %s1412_s30 = sphi %s1488_s30, %s1809_s30   ;;  %s1408_s29 = sphi %s1486_s29, %s1808_s29   ;;  %s1404_s28 = sphi %s1484_s28, %s1816_s28   ;;  %s1400_s27 = sphi %s1482_s27, %s1815_s27   ;;  %s1396_s26 = sphi %s1480_s26, %s1806_s26   ;;  %s1392_s25 = sphi %s1478_s25, %s1814_s25   ;;  %s1388_s24 = sphi %s1476_s24, %s1813_s24  }
   0xa   : > { %1785 = sst [smem:[#allocation10_spill]] %s1400_s27  ;;  %s1049_s13 = sadd.s32 4294967294, %s1428_s11  }
   0xb   : > { %1786 = sst [smem:[#allocation11_spill]] %s1408_s29  ;;  %s33_s14 = sadd.s32 1, %s1420_s9 }
   0xc   : > { %1787 = sst [smem:[#allocation12_spill]] %s1420_s9  ;;  %s36_s15 = sadd.s32 1, %s1424_s10 }
   0xd   : > { %1788 = sst [smem:[#allocation13_spill]] %s1424_s10  ;;  %p34_p0 = scmp.ge.s32.totalorder %s33_s14, 4 }
   0xe   : > { %s194_s16 = sadd.s32 1, %s1408_s29  ;;  %p204_p1 = scmp.ne.s32.totalorder %s1408_s29, %s1404_s28 }
   0xf   : > { %p1538_p2 = scmp.eq.s32.totalorder %s1048_s12, 7  ;;  %s1818_s14 = smov (%p34_p0, %s33_s14), 0 }
  0x10   : > { %1790 = sst [smem:[#allocation14_spill]] %s1818_s14  ;;  %s1820_s15 = smov (!%p34_p0, %s36_s15), %s1424_s10 }
  0x11   : > { %p1547_p3 = por %p1538_p2, %p204_p1  ;;  %p210_p4 = scmp.ne.s32.totalorder %s1404_s28, %s1400_s27 }
  0x12   : > { %p38_p5 = scmp.ge.s32.totalorder %s1820_s15, 2  ;;  %p1553_p6 = scmp.eq.s32.totalorder %s1049_s13, 7 }
  0x13   : > { %s218_s20 = ssub.s32 %s1420_s9, %s1818_s14  ;;  %s222_s21 = sadd.s32 1, %s1396_s26 }
  0x14   : > { %s1822_s15 = smov (%p38_p5, %s1820_s15), 0  ;;  %p1564_p7 = por %p1553_p6, %p210_p4 }
  0x15   : > { %1793 = sst [smem:[#allocation15_spill]] %s1822_s15  ;;  %p232_p8 = scmp.ne.s32.totalorder %s1396_s26, %s1392_s25 }
  0x16   : > { %s191_s23 = ssub.s32 %s1424_s10, %s1822_s15  ;;  %p238_p9 = scmp.ne.s32.totalorder %s1392_s25, %s1388_s24 }
  0x17   : > { %p192_p10 = scmp.eq.s32.totalorder %s191_s23, 0  ;;  %s219_s12 = sor.u32 %s218_s20, %s191_s23 }
  0x18   : > { %p220_p11 = scmp.eq.s32.totalorder %s219_s12, 0  ;;  %p1576_p12 = por %p232_p8, %p1538_p2 }
  0x19   : > { %s1581_s14 = scalar_select %p192_p10, %s1408_s29, %s194_s16  }
  0x1a   : > { %s1584_s9 = scalar_select %p220_p11, %s1396_s26, %s222_s21  }
  0x1b   : > { %1796 = sst [smem:[#allocation16_spill]] %s1581_s14  ;;  %p1588_p13 = por %p238_p9, %p1553_p6 }
  0x1c   : > { %1797 = sst [smem:[#allocation17_spill]] %s1584_s9  ;;  %p1052_p0 = scmp.ge.s32.totalorder %s1428_s11, 1 }
  0x1d   : > { %s1798_s27 = scalar_select %p1588_p13, 1, 0 }
  0x1e   : > { %p298_p1 = scmp.lt.s32.totalorder %s1428_s11, 9 }
  0x1f   : > { %1799 = sst [smem:[#allocation18_spill]] %s1798_s27 }
  0x20   : > { %p299_p4 = pnand %p1052_p0, %p298_p1 }
  0x21   : > { %s1777_s17 = sand.u32 (!%p299_p4), 1, %s1404_s28   ;;  %p357_p2 = scmp.lt.s32.totalorder (!%p299_p4), %s1412_s30, 3  ;;  %v1430_v0 = vmov (!%p299_p4), 0.0|0.0   ;;  %vm1431_vm0 = vmmov (!%p299_p4), 0   ;;  %v1432_v1 = vmov (!%p299_p4), 0.0   ;;  %vm390_vm1 = vcmask (!%p299_p4), 261120  }
  0x22   : > { %302 = sbr.rel (%p299_p4) target bundleno = 1288 (0x508), region = 44  ;;  %1158 = vmatprep.subr.bf16.mxu1 (!%p299_p4), %v1430_v0  ;;  %s1599_s16 = sshll.u32 (!%p299_p4), %s1777_s17, 3  ;;  %1152 = vmatprep.subr.bf16.mxu0 (!%p299_p4), %v1430_v0  ;;  %vm605_vm2 = vcmask (!%p299_p4), 64512  }
  0x23   : > { %p353_p5 = scmp.lt.s32.totalorder (!%p299_p4), %s1416_s8, 1  ;;  %1123 = vmatprep.mubr.msk.f32.mxu1 (!%p299_p4), %vm1431_vm0, %v1432_v1  ;;  %1112 = vmatprep.mubr.msk.f32.mxu0 (!%p299_p4), %vm1431_vm0, %v1432_v1  ;;  %p1069_p6 = scmp.ne.s32.totalorder (!%p299_p4), %s1412_s30, 0 }
  0x29   : > { %s358_s19 = scalar_select %p357_p2, %s1412_s30, 3 }
  0x2a   : > { %s354_s20 = scalar_select %p353_p5, %s1416_s8, 1 }
  0x2b   : > { %s1609_s21 = sshll.u32 %s358_s19, 5  ;;  %s1062_s23 = sshll.u32 %s358_s19, 3  ;;  %v1433_v42 = vmov (!%p1069_p6), 0.0  }
  0x2c   : > { %s366_s15 = scalar_lea.vmem %s1768_s2, %s1609_s21  ;;  %s375_s29 = scalar_lea.vmem %s1770_s4, %s1062_s23  ;;  %771 = vst.msk [vmem:[#allocation2] sm:$0xff] (!%p1069_p6), %vm390_vm1, %v1433_v42 }
  0x2d   : > { %v381_v2 = vld [vmem:[%s366_s15] sm:$0xff]  ;;  %v382_v3 = vld [vmem:[%s366_s15 + $0x8] sm:$0xff]  ;;  %s361_s27 = scalar_lea.vmem %s1767_s1, %s1609_s21  ;;  %v383_v4 = vld [vmem:[%s366_s15 + $0x10] sm:$0xff]  ;;  %s1055_s19 = sshll.u32 %s354_s20, 3 }
  0x2e   : > { %v1622_v5 = vld [vmem:[%s375_s29] sm:$0xff]  ;;  %v1159_v6 = vpack.c.bf16 %v382_v3, %v381_v2  ;;  %v378_v8 = vld [vmem:[%s361_s27 + $0x8] sm:$0xff]  ;;  %v384_v10 = vld [vmem:[%s366_s15 + $0x18] sm:$0xff]  ;;  %s356_s9 = scalar_lea.vmem %s1766_s0, %s1055_s19  ;;  %s371_s14 = scalar_lea.vmem %s1769_s3, %s1609_s21 }
  0x2f   : > { %v377_v7 = vld [vmem:[%s361_s27] sm:$0xff]  ;;  %v379_v11 = vld [vmem:[%s361_s27 + $0x10] sm:$0xff]  ;;  %v380_v12 = vld [vmem:[%s361_s27 + $0x18] sm:$0xff]  ;;  %v1162_v13 = vpack.c.bf16 %v384_v10, %v383_v4  ;;  %s1783_s15 = sand.u32 1, %s1392_s25   ;;  %s345_s21 = scalar_lea.vmem [#allocation3], %s1599_s16 }
  0x30   : > { %v1153_v9 = vpack.c.bf16 %v378_v8, %v377_v7  ;;  %1160 = vmatpush3.bf16.msra.mxu1 %v1159_v6  ;;  %v1156_v14 = vpack.c.bf16 %v380_v12, %v379_v11  ;;  %v376_v15 = vld [vmem:[%s356_s9] sm:$0xff]  ;;  %v386_v22 = vld [vmem:[%s371_s14 + $0x8] sm:$0xff]  ;;  %v387_v23 = vld [vmem:[%s371_s14 + $0x10] sm:$0xff]  ;;  %s1653_s17 = sshll.u32 %s1783_s15, 3 }
  0x31   : > { %1161 = vmatprep.subr.bf16.mxu1 %v1430_v0  ;;  %v385_v21 = vld [vmem:[%s371_s14] sm:$0xff]  ;;  %v388_v25 = vld [vmem:[%s371_s14 + $0x18] sm:$0xff]  ;;  %s352_s20 = scalar_lea.vmem [#allocation5], %s1653_s17 }
  0x32   : > { %1154 = vmatpush3.bf16.msra.mxu0 %v1153_v9  ;;  %v1165_v24 = vpack.c.bf16 %v386_v22, %v385_v21  ;;  %v1168_v26 = vpack.c.bf16 %v388_v25, %v387_v23 }
  0x33   : > { %1155 = vmatprep.subr.bf16.mxu0 %v1430_v0 }
  0x34   : > { %1163 = vmatpush3.bf16.msra.mxu1 %v1162_v13 }
  0x35   : > { %1137 = vmatprep.subr.mxu1 %v1432_v1 }
  0x36   : > { %1157 = vmatpush3.bf16.msra.mxu0 %v1156_v14 }
  0x37   : > { %1164 = vmatprep.subr.bf16.mxu0 %v1430_v0  ;;  %1124 = vmatmul.mubr.msk.f32.vlgmr.msra.gmra.mrb[0].mxu1 %vm390_vm1, %v376_v15 }
  0x38   : > { %1139 = vmatprep.mubr.msk.f32.mxu1 %vm1431_vm0, %v1432_v1 }
  0x39   : > { %1113 = vmatmul.mubr.msk.f32.vlgmr.msra.gmra.mrb[0].mxu0 %vm390_vm1, %v376_v15 }
  0x3a   : > { %1134 = vmatprep.mubr.msk.f32.mxu0 %vm1431_vm0, %v1432_v1  ;;  %1166 = vmatpush3.bf16.msra.mxu0 %v1165_v24 }
  0x3b   : > { %1167 = vmatprep.subr.bf16.mxu0 %v1430_v0 }
  0x3e   : > { %1169 = vmatpush3.bf16.msra.mxu0 %v1168_v26 }
  0x41   : > { %1135 = vmatmul.mubr.msk.f32.vlgmr.msra.gmra.mrb[2].mxu0 %vm390_vm1, %v376_v15 }
 0x10a   : > { %v531_v16 = vpop.f32.mrb[0].mxu1 }
 0x10b   : > { %v1125_v18 = vpop.f32.mrb[1].mxu1  ;;  %1138 = vmatpush3.xpose.msk.msra.mxu1 %vm605_vm2, %v531_v16 }
 0x10c   : > { %v460_v17 = vpop.f32.mrb[0].mxu0  ;;  %1142 = vmatprep.subr.mxu1 %v1432_v1 }
 0x10d   : > { %v464_v19 = vmul.f32 0.35355338, %v460_v17  ;;  %v1114_v20 = vpop.f32.mrb[1].mxu0 }
 0x10f   : > { %1140 = vmatmul.mubr.msk.f32.vlgmr.msra.gmra.mrb[2].mxu1 %vm605_vm2, %v464_v19 }
 0x110   : > { %1144 = vmatprep.mubr.msk.f32.mxu1 %vm1431_vm0, %v1432_v1 }
 0x114   : > { %v601_v35 = vpop.f32.mrb[2].mxu0 }
 0x115   : > { %v1136_v36 = vpop.f32.mrb[3].mxu0  ;;  %1143 = vmatpush3.msra.mxu1 %v601_v35 }
 0x1e2   : > { %v678_v27 = vpop.f32.mrb[2].mxu1 }
 0x1e3   : > { %v1141_v28 = vpop.f32.mrb[3].mxu1  ;;  %v682_v29 = vsel %vm605_vm2, %v678_v27, -inf }
 0x1e4   : > { %683 = vmax.xlane.f32.xlu0 %v682_v29 }
 0x271   : > { %v684_v30 = vpop.xlane.xlu0 %683 }
 0x272   : > { %v685_v31 = vsub.f32 %v678_v27, %v684_v30 }
 0x274   : > { %v686_v32 = vmul.f32 1.442695, %v685_v31 }
 0x276   : > { %1274 = vpow2.f32 %v686_v32 }
 0x280   : > { %v1275_v33 = vpop.eup %1274 }
 0x281   : > { %v688_v34 = vsel %vm605_vm2, %v1275_v33, 0.0 }
 0x282   : > { %689 = vadd.xlane.f32.xlu0 %v688_v34 }
 0x30f   : > { %v690_v37 = vpop.xlane.xlu0 %689 }
 0x310   : > { %1276 = vrcp.f32 %v690_v37 }
 0x31a   : > { %v1277_v38 = vpop.eup %1276 }
 0x31b   : > { %v692_v39 = vmul.f32 %v1277_v38, %v1275_v33 }
 0x31d   : > { %693 = vst.msk [vmem:[%s352_s20] sm:$0xff] %vm605_vm2, %v692_v39  ;;  %1145 = vmatmul.mubr.msk.f32.vlgmr.msra.gmra.mrb[4].mxu1 %vm605_vm2, %v692_v39 }
 0x3eb   : > { %770 = sbr.rel (%p1069_p6) target bundleno = 1010 (0x3f2), region = 48 }
 0x3f0   : > { %v763_v40 = vpop.f32.mrb[4].mxu1 }
 0x3f1   : > { %v1146_v41 = vpop.f32.mrb[5].mxu1 }
 0x3f2 PF: > { %1147 = vmatprep.subr.mxu0 %v1432_v1  ;;  %1149 = vmatprep.mubr.msk.f32.mxu0 %vm1431_vm0, %v1432_v1  ;;  %v772_v43 = vld [vmem:[#allocation2] sm:$0xff]  ;;  %p1071_p8 = scmp.ne.s32.totalorder %s1412_s30, 3 }
 0x3f3   : > { %1148 = vmatpush3.msra.mxu0 %v1622_v5  ;;  %v1072_v48 = vld [vmem:[%s1771_s5] ss:$0 sm:$0xff] (!%p1071_p8) }
 0x3f4   : > { %1150 = vmatmul.mubr.msk.f32.vlgmr.msra.gmra.mrb[4].mxu0 %vm605_vm2, %v763_v40 }
 0x4c4   : > { %851 = sbr.rel (%p1071_p8) target bundleno = 1237 (0x4d5), region = 52 }
 0x4c7   : > { %v842_v44 = vpop.f32.mrb[4].mxu0 }
 0x4c8   : > { %v846_v45 = vadd.f32 %v842_v44, %v772_v43  ;;  %v1151_v46 = vpop.f32.mrb[5].mxu0 }
 0x4ca   : > { %847 = vst.msk [vmem:[#allocation2] sm:$0xff] %vm390_vm1, %v846_v45 }
 0x4d1   : > { %v852_v47 = vld [vmem:[#allocation2] sm:$0xff] }
 0x4d2   : > { %v860_v49 = vadd.f32 %v1072_v48, %v852_v47 }
 0x4d4   : > { %861 = vst.msk [vmem:[%s345_s21] sm:$0xff] %vm390_vm1, %v860_v49 }
 0x4d5 PF: > { %s1075_s12 = sshll.u32 %s1416_s8, 7  ;;  %s881_s9 = sshll.u32 %s345_s21, 4  ;;  %s882_s9 = int_to_ptr.vmem [resolvable:$true] %s881_s9 }
 0x4d6   : > { %s1678_s26 = scalar_lea.hbm %s1772_s6, %s1075_s12  ;;  %s1800_s27 = sand.u32 1, %s1404_s28  }
 0x4d7   : > { %s863_s29 = scalar_lea.sflag [#allocation4], %s1800_s27  ;;  %s1278_s14 = scalar_lea.vmem %s882_s9, 128 }
 0x4d8   : > { %p1279_p9 = scmp.ne.s32.totalorder %s882_s9, %s1278_s14  ;;  %s1434_s16 = smov [#allocation3]  }
 0x4d9   : > { %s1282_s23 = sshll.u32 %s1434_s16, 4  ;;  %s1283_s23 = int_to_ptr.vmem [resolvable:$false] %s1282_s23 }
 0x4da   : > { %p1280_p10 = pnand %p1279_p9, %p1547_p3  ;;  %s1284_s15 = scalar_lea.vmem %s1283_s23, 256 }
 0x4db   : > { %p1285_p0 = scmp.lt.s32.totalorder %s882_s9, %s1283_s23  ;;  %p1286_p1 = scmp.lt.s32.totalorder %s1284_s15, %s1278_s14 }
 0x4dc   : > { %p1281_p11 = pneg %p1280_p10 }
 0x4dd   : > { %p1287_p4 = por %p1286_p1, %p1285_p0 }
 0x4df   : > { %p1288_p2 = pnand %p1287_p4, %p1281_p11 }
 0x4e1   : > { %1291 = shalt.err (!%p1288_p2)
}
 0x4e2   : > { %s1292_s21 = scalar_lea.hbm %s1678_s26, 128  ;;  %s1296_s10 = scalar_lea.hbm %s1772_s6, 256 }
 0x4e3   : > { %p1293_p5 = scmp.ne.s32.totalorder %s1678_s26, %s1292_s21  ;;  %p1297_p9 = scmp.lt.u32.totalorder %s1678_s26, %s1772_s6 }
 0x4e4   : > { %p1298_p10 = scmp.lt.u32.totalorder %s1296_s10, %s1292_s21  ;;  %p1300_p0 = scmp.lt.u32.totalorder %s1292_s21, %s1678_s26 }
 0x4e5   : > { %p1294_p6 = pnand %p1293_p5, %p1547_p3 }
 0x4e6   : > { %p1299_p11 = por %p1298_p10, %p1297_p9 }
 0x4e7   : > { %p1295_p8 = pneg %p1294_p6 }
 0x4e8   : > { %p1301_p1 = por %p1300_p0, %p1299_p11 }
 0x4ea   : > { %p1302_p4 = pnand %p1301_p1, %p1295_p8 }
 0x4ec   : > { %1305 = shalt.err (!%p1302_p4)
}
 0x4ed   : > { %1170 = dma.vmem_to_hbm [thread:$0]  (%p1547_p3), %s882_s9, 128, %s1678_s26, %s863_s29  }
 0x4ee   : > { %s1076_s15 = sshll.u32 %s1416_s8, 2  ;;  %s896_s14 = sshll.u32 %s352_s20, 4  ;;  %s1703_s14 = int_to_ptr.vmem [resolvable:$true] %s896_s14 }
 0x4ef   : > { %s892_s23 = sadd.s32 %s1412_s30, %s1076_s15  ;;  %s1801_s10 = sand.u32 1, %s1392_s25  }
 0x4f0   : > { %s1077_s21 = sshll.u32 %s892_s23, 7  ;;  %s868_s27 = scalar_lea.sflag [#allocation6], %s1801_s10 }
 0x4f1   : > { %s894_s18 = scalar_lea.hbm %s1773_s7, %s1077_s21  ;;  %s1306_s16 = scalar_lea.vmem %s1703_s14, 128 }
 0x4f2   : > { %p1307_p2 = scmp.ne.s32.totalorder %s1703_s14, %s1306_s16  ;;  %s1435_s8 = smov [#allocation5]  }
 0x4f3   : > { %s1310_s17 = sshll.u32 %s1435_s8, 4  ;;  %s1311_s17 = int_to_ptr.vmem [resolvable:$false] %s1310_s17 }
 0x4f4   : > { %p1308_p3 = pnand %p1307_p2, %p1576_p12  ;;  %s1312_s30 = scalar_lea.vmem %s1311_s17, 256 }
 0x4f5   : > { %p1313_p6 = scmp.lt.s32.totalorder %s1703_s14, %s1311_s17  ;;  %p1314_p8 = scmp.lt.s32.totalorder %s1312_s30, %s1306_s16 }
 0x4f6   : > { %p1309_p5 = pneg %p1308_p3 }
 0x4f7   : > { %p1315_p9 = por %p1314_p8, %p1313_p6 }
 0x4f9   : > { %p1316_p10 = pnand %p1315_p9, %p1309_p5 }
 0x4fb   : > { %1319 = shalt.err (!%p1316_p10)
}
 0x4fc   : > { %s1320_s20 = scalar_lea.hbm %s894_s18, 128  ;;  %s1324_s29 = scalar_lea.hbm %s1773_s7, 1024 }
 0x4fd   : > { %p1321_p11 = scmp.ne.s32.totalorder %s894_s18, %s1320_s20  ;;  %p1325_p4 = scmp.lt.u32.totalorder %s894_s18, %s1773_s7 }
 0x4fe   : > { %p1326_p2 = scmp.lt.u32.totalorder %s1324_s29, %s1320_s20  ;;  %p1328_p13 = scmp.lt.u32.totalorder %s1320_s20, %s894_s18 }
 0x4ff   : > { %p1322_p0 = pnand %p1321_p11, %p1576_p12 }
 0x500   : > { %p1327_p3 = por %p1326_p2, %p1325_p4 }
 0x501   : > { %p1323_p1 = pneg %p1322_p0 }
 0x502   : > { %p1329_p6 = por %p1328_p13, %p1327_p3 }
 0x504   : > { %p1330_p5 = pnand %p1329_p6, %p1323_p1 }
 0x506   : > { %1333 = shalt.err (!%p1330_p5)
}
 0x507   : > { %1171 = dma.vmem_to_hbm [thread:$0]  (%p1576_p12), %s1703_s14, 128, %s894_s18, %s868_s27  }
 0x508 PF: > { %s1802_s21 = sld [smem:[#allocation10_spill]]  ;;  %p1181_p8 = scmp.ge.s32.totalorder %s1428_s11, 2 }
 0x50a   : > { %p1175_p9 = pnand %p1181_p8, %p1564_p7 }
 0x50e   : > { %s908_s12 = sand.u32 1, %s1802_s21  }
 0x50f   : > { %s909_s19 = scalar_lea.sflag [#allocation4], %s908_s12 }
 0x510   : > { %1379 = dma.done.wait (!%p1175_p9), %s909_s19, 128  }
 0x511   : > { %1381 = vsyncadd (!%p1175_p9), %s909_s19, 4294967168  ;;  %s1803_s10 = sld [smem:[#allocation18_spill]]  ;;  %s917_s16 = sand.u32 1, %s1388_s24  }
 0x512   : > { %s918_s8 = scalar_lea.sflag [#allocation6], %s917_s16 }
 0x517   : > { %p1804_p13 = scmp.ne.s32.totalorder %s1803_s10, 0 }
 0x519   : > { %p1178_p10 = pnand %p1181_p8, %p1804_p13 }
 0x51b   : > { %1383 = dma.done.wait (!%p1178_p10), %s918_s8, 128  }
 0x51c   : > { %1385 = vsyncadd (!%p1178_p10), %s918_s8, 4294967168  ;;  %s24_s11 = sadd.s32 1, %s1428_s11   ;;  %s1805_s13 = sld [smem:[#allocation9_spill]] }
 0x51d   : > { %p21_p12 = scmp.ge.s32.totalorder %s24_s11, 10   ;;  %s1806_s26 = sld [smem:[#allocation17_spill]] }
 0x51e   : > { %s1807_s22 = sld [smem:[#allocation11_spill]]  ;;  %s1808_s29 = sld [smem:[#allocation16_spill]] }
 0x51f   : > { %s1809_s30 = sld [smem:[#allocation12_spill]]  ;;  %s1810_s8 = sld [smem:[#allocation13_spill]] }
 0x520   : > { %s1811_s9 = sld [smem:[#allocation14_spill]]  ;;  %s1812_s10 = sld [smem:[#allocation15_spill]] }
 0x521   : > { %s1813_s24 = smov %s1392_s25  ;;  %s1815_s27 = smov %s1404_s28 }
 0x522   : > { %s1814_s25 = smov %s1805_s13  ;;  %23 = sbr.rel (!%p21_p12) target bundleno = 9 (0x9), region = 116 }
 0x524   : > { %s1816_s28 = smov %s1807_s22 }
 0x529   :  { %923 = vsyncpa [#allocation4], 1 }
 0x52a   :  { %925 = vsyncpa [#allocation4 + $0x1], 1 }
 0x52b   :  { %926 = vsyncpa [#allocation6], 1 }
 0x52c   :  { %928 = vsyncpa [#allocation6 + $0x1], 1 }

</bundles_post_ra>
